<compile_context>
chip_gen: v7x
topology: tpu7x:2x2x1
jax: 0.10.0
libtpu: 0.0.40
codegen_flags: <defaults>
</compile_context>

<pallas_src>
import jax
import jax.numpy as jnp
from jax import lax
from jax.experimental import pallas as pl
from jax.experimental.pallas import tpu as pltpu


# ------------------------------ kernel body ------------------------------ #

def _layernorm_cf_kernel(x_ref, w_ref, b_ref, o_ref, *, eps):
    # x_ref: (BN, C, TM)   w_ref/b_ref: (1, C, 1)  (pre-shaped in the wrapper,
    # resident in VMEM across the whole grid via a constant index_map).
    x = x_ref[...].astype(jnp.float32)                    # (BN, C, TM)

    # Two-pass moments (matches PyTorch exactly; no catastrophic cancellation
    # when |mean| >> std).  Cross-sublane reduces go to the XLU; the extra
    # VALU work is free in this HBM-bound kernel.
    u = jnp.mean(x, axis=1, keepdims=True)                # (BN, 1, TM)
    d = x - u
    var = jnp.mean(d * d, axis=1, keepdims=True)          # (BN, 1, TM)
    inv = lax.rsqrt(var + eps)                            # EUP slot

    w = w_ref[...].astype(jnp.float32)                    # (1, C, 1)
    b = b_ref[...].astype(jnp.float32)                    # (1, C, 1)

    # y = (x - u) * (inv * w) + b
    o_ref[...] = (d * (inv * w) + b).astype(o_ref.dtype)


# ------------------------------ tiling policy ----------------------------- #

def _cdiv(a, b):
    return -(-a // b)


def _round_up(v, m):
    return _cdiv(v, m) * m


def _vmem_capacity_bytes():
    """Physical VMEM of the current chip; conservative fallback if unknown."""
    try:
        return int(pltpu.get_tpu_info().vmem_capacity_bytes)
    except Exception:
        return 64 << 20   # v7x-sized fallback: safe everywhere


def _choose_blocking(N, C, M, itemsize, budget, forced_tile_m=None):
    """Pick (bn, tile_m): batch rows per block and lane (spatial) tile width.

    tile_m is either the full spatial extent M (single lane block) or a
    multiple of 128 (lane-dense, unmasked stores); the grid uses cdiv so no
    divisor-of-M requirement.  bn > 1 only when a single lane tile already
    covers M and the per-step payload would otherwise be tiny.
    """
    # Sublane packing of the x dtype: f32 -> 8 rows/vreg, bf16 -> 16, i8 -> 32.
    sub = 8 if itemsize >= 4 else max(8, 32 // max(itemsize, 1))
    c_pad = _round_up(C, sub)
    # VMEM bytes per lane column of a (1, C, *) block: double-buffered input
    # + double-buffered output in x dtype, plus ~4 f32 temporaries in-body.
    col_bytes = c_pad * (4 * itemsize + 16)

    if forced_tile_m is not None:
        t = min(int(forced_tile_m), _round_up(M, 128))
        tile_m = M if t >= M else max(128, _round_up(t, 128))
    elif M <= 128:
        tile_m = M                      # full (short) lane dim; known slow path
    else:
        cap = max(128, (budget // col_bytes) // 128 * 128)
        n_m = _cdiv(M, cap)
        # Give the v7x megacore (2 TCs) + pipeline at least ~4 steps when the
        # tiles can stay >= 512 lanes.  No-op cost on v5e/v6e (mem-bound).
        if N * n_m < 4 and M >= 4 * 512:
            n_m = max(n_m, min(_cdiv(4, max(N, 1)), M // 512))
        # Evenness nudge so the 2 v7x cores get balanced work (best effort).
        if (N * n_m) % 2 == 1 and n_m > 1:
            n_m += 1
        # Balanced tiles: round ceil(M/n_m) up to a multiple of 128 so every
        # block (except possibly a small tail) is lane-dense and ~equal sized.
        tile_m = M if n_m == 1 else _round_up(_cdiv(M, n_m), 128)

    m_blocks = _cdiv(M, tile_m)

    # Batch blocking: when one lane tile already covers M and the per-step
    # payload is small (deep UNeXt stages), move several batch rows per step
    # so each grid step amortizes the ~0.35us step overhead.
    bn = 1
    if m_blocks == 1 and N > 1:
        step_bytes = c_pad * tile_m * itemsize
        if step_bytes < (2 << 20):
            bn_budget = max(1, budget // max(col_bytes * tile_m, 1))
            bn_payload = max(1, (2 << 20) // max(step_bytes, 1))
            bn = min(N, bn_budget, bn_payload)
            if bn >= N:                 # keep >= 2 grid steps for the megacore
                bn = _cdiv(N, 2)
    return bn, tile_m


# --------------------------------- wrapper -------------------------------- #

def layernorm_channels_first(x, weight, bias, eps=1e-6, tile_m=None,
                             vmem_budget_bytes=None):
    """x: (N, C, *spatial); weight/bias: (C,). Returns same shape/dtype as x."""
    N, C = int(x.shape[0]), int(x.shape[1])
    M = 1
    for s in x.shape[2:]:
        M *= int(s)
    itemsize = jnp.dtype(x.dtype).itemsize

    # Generation-aware VMEM budget / scoped limit (v5e/v6e: 128 MiB physical,
    # v7x: 64 MiB).  Budget caps the pipelined block footprint; the explicit
    # limit clears v5e's 16 MiB scoped default and leaves headroom on v7x.
    vmem_cap = _vmem_capacity_bytes()
    vmem_limit = min(int(0.75 * vmem_cap), 64 << 20)       # 64 MiB / 48 MiB
    if vmem_budget_bytes is None:
        vmem_budget_bytes = min(int(0.30 * vmem_cap), 40 << 20)
    vmem_budget_bytes = max(1 << 20,
                            min(int(vmem_budget_bytes), int(0.8 * vmem_limit)))

    bn, tile_m = _choose_blocking(N, C, M, itemsize, vmem_budget_bytes,
                                  forced_tile_m=tile_m)

    x3 = x.reshape(N, C, M)
    w3 = weight.reshape(1, C, 1)
    b3 = bias.reshape(1, C, 1)

    grid = (_cdiv(N, bn), _cdiv(M, tile_m))

    cost = pl.CostEstimate(
        flops=8 * N * C * M,
        transcendentals=N * M,
        bytes_accessed=2 * N * C * M * itemsize
        + 2 * C * jnp.dtype(weight.dtype).itemsize,
    )

    out = pl.pallas_call(
        lambda xr, wr, br, orf: _layernorm_cf_kernel(xr, wr, br, orf, eps=eps),
        out_shape=jax.ShapeDtypeStruct((N, C, M), x.dtype),
        grid_spec=pltpu.PrefetchScalarGridSpec(
            num_scalar_prefetch=0,
            grid=grid,
            in_specs=[
                pl.BlockSpec((bn, C, tile_m), lambda n, m: (n, 0, m)),
                # weight/bias: constant index_map -> resident across the grid
                pl.BlockSpec((1, C, 1), lambda n, m: (0, 0, 0)),
                pl.BlockSpec((1, C, 1), lambda n, m: (0, 0, 0)),
            ],
            out_specs=pl.BlockSpec((bn, C, tile_m), lambda n, m: (n, 0, m)),
        ),
        compiler_params=pltpu.CompilerParams(
            dimension_semantics=("parallel", "parallel"),
            vmem_limit_bytes=int(vmem_limit),
        ),
        cost_estimate=cost,
    )(x3, w3, b3)

    return out.reshape(x.shape)


# ------------------------------- reference -------------------------------- #

def layernorm_ref(x, weight, bias, eps=1e-6):
    xf = x.astype(jnp.float32)
    u = jnp.mean(xf, axis=1, keepdims=True)
    s = jnp.mean((xf - u) ** 2, axis=1, keepdims=True)
    y = (xf - u) / jnp.sqrt(s + eps)
    bshape = (1, x.shape[1]) + (1,) * (x.ndim - 2)
    y = weight.reshape(bshape) * y + bias.reshape(bshape)
    return y.astype(x.dtype)


# ---------------------------------- main ----------------------------------- #

if __name__ == "__main__":
    key = jax.random.PRNGKey(0)
    k0, k1, k2, k3 = jax.random.split(key, 4)

    # Primary case: matches the module's default init (ones / zeros).
    N, C, D, H, W = 2, 4, 8, 8, 8
    x = jax.random.normal(k0, (N, C, D, H, W), dtype=jnp.float32)
    weight = jnp.ones((C,), dtype=jnp.float32)
    bias = jnp.zeros((C,), dtype=jnp.float32)

    out = layernorm_channels_first(x, weight, bias, eps=1e-6)
    out = jax.block_until_ready(out)
    ref = layernorm_ref(x, weight, bias, eps=1e-6)
    assert out.shape == x.shape and out.dtype == x.dtype
    assert float(jnp.max(jnp.abs(out - ref))) < 1e-4

    # Secondary case: non-128-multiple spatial extent + nontrivial affine +
    # batch-row blocking (small M), exercising the full-dim lane-block path.
    N2, C2, D2, H2, W2 = 4, 6, 5, 6, 7
    x2 = jax.random.normal(k1, (N2, C2, D2, H2, W2), dtype=jnp.float32)
    w2 = 1.0 + 0.1 * jax.random.normal(k2, (C2,), dtype=jnp.float32)
    b2 = 0.1 * jax.random.normal(k3, (C2,), dtype=jnp.float32)

    out2 = layernorm_channels_first(x2, w2, b2, eps=1e-6)
    out2 = jax.block_until_ready(out2)
    ref2 = layernorm_ref(x2, w2, b2, eps=1e-6)
    assert out2.shape == x2.shape and out2.dtype == x2.dtype
    assert float(jnp.max(jnp.abs(out2 - ref2))) < 1e-4

    print("KERNEL_OK")
</pallas_src>

<mosaic_0001>
module attributes {stable_mosaic.version = 11 : i64} {
  func.func @_lambda_(%arg0: i32, %arg1: i32, %arg2: memref<1x4x512xf32, #tpu.memory_space<vmem>>, %arg3: memref<1x4x1xf32, #tpu.memory_space<vmem>>, %arg4: memref<1x4x1xf32, #tpu.memory_space<vmem>>, %arg5: memref<1x4x512xf32, #tpu.memory_space<vmem>>) attributes {dimension_semantics = [#tpu.dimension_semantics<parallel>, #tpu.dimension_semantics<parallel>], iteration_bounds = array<i64: 2, 1>, scalar_prefetch = 0 : i64, scratch_operands = 0 : i64, tpu.core_type = #tpu.core_type<tc>, window_params = [{transform_indices = @transform_0, window_bounds = array<i64: 1, 4, 512>}, {pipeline_mode = #tpu.pipeline_mode<synchronous>, transform_indices = @transform_1, window_bounds = array<i64: 1, 4, 1>}, {pipeline_mode = #tpu.pipeline_mode<synchronous>, transform_indices = @transform_2, window_bounds = array<i64: 1, 4, 1>}, {transform_indices = @transform_3, window_bounds = array<i64: 1, 4, 512>}]} {
    %c0 = arith.constant 0 : index
    %c0_0 = arith.constant 0 : index
    %c0_1 = arith.constant 0 : index
    %0 = vector.load %arg2[%c0, %c0_0, %c0_1] : memref<1x4x512xf32, #tpu.memory_space<vmem>>, vector<1x4x512xf32>
    %cst = arith.constant dense<0.000000e+00> : vector<1x512xf32>
    %1 = vector.multi_reduction <add>, %0, %cst [1] : vector<1x4x512xf32> to vector<1x512xf32>
    %2 = vector.shape_cast %1 : vector<1x512xf32> to vector<1x1x512xf32>
    %cst_2 = arith.constant 4.000000e+00 : f32
    %3 = vector.broadcast %cst_2 : f32 to vector<1x1x512xf32>
    %4 = arith.divf %2, %3 : vector<1x1x512xf32>
    %5 = vector.broadcast %4 : vector<1x1x512xf32> to vector<1x4x512xf32>
    %6 = arith.subf %0, %5 : vector<1x4x512xf32>
    %7 = arith.mulf %6, %6 : vector<1x4x512xf32>
    %cst_3 = arith.constant dense<0.000000e+00> : vector<1x512xf32>
    %8 = vector.multi_reduction <add>, %7, %cst_3 [1] : vector<1x4x512xf32> to vector<1x512xf32>
    %9 = vector.shape_cast %8 : vector<1x512xf32> to vector<1x1x512xf32>
    %cst_4 = arith.constant 4.000000e+00 : f32
    %10 = vector.broadcast %cst_4 : f32 to vector<1x1x512xf32>
    %11 = arith.divf %9, %10 : vector<1x1x512xf32>
    %cst_5 = arith.constant 9.99999997E-7 : f32
    %12 = vector.broadcast %cst_5 : f32 to vector<1x1x512xf32>
    %13 = arith.addf %11, %12 : vector<1x1x512xf32>
    %14 = math.rsqrt %13 : vector<1x1x512xf32>
    %c0_6 = arith.constant 0 : index
    %c0_7 = arith.constant 0 : index
    %c0_8 = arith.constant 0 : index
    %15 = vector.load %arg3[%c0_6, %c0_7, %c0_8] : memref<1x4x1xf32, #tpu.memory_space<vmem>>, vector<1x4x1xf32>
    %c0_9 = arith.constant 0 : index
    %c0_10 = arith.constant 0 : index
    %c0_11 = arith.constant 0 : index
    %16 = vector.load %arg4[%c0_9, %c0_10, %c0_11] : memref<1x4x1xf32, #tpu.memory_space<vmem>>, vector<1x4x1xf32>
    %17 = vector.broadcast %14 : vector<1x1x512xf32> to vector<1x4x512xf32>
    %18 = vector.broadcast %15 : vector<1x4x1xf32> to vector<1x4x512xf32>
    %19 = arith.mulf %17, %18 : vector<1x4x512xf32>
    %20 = arith.mulf %6, %19 : vector<1x4x512xf32>
    %21 = vector.broadcast %16 : vector<1x4x1xf32> to vector<1x4x512xf32>
    %22 = arith.addf %20, %21 : vector<1x4x512xf32>
    %c0_12 = arith.constant 0 : index
    %c0_13 = arith.constant 0 : index
    %c0_14 = arith.constant 0 : index
    %23 = vector.load %arg5[%c0_12, %c0_13, %c0_14] : memref<1x4x512xf32, #tpu.memory_space<vmem>>, vector<1x4x512xf32>
    tpu.vector_store %arg5[%c0_12, %c0_13, %c0_14], %22 {strides = array<i32>} : memref<1x4x512xf32, #tpu.memory_space<vmem>>, vector<1x4x512xf32>,
    return
  }
  func.func @transform_0(%arg0: i32, %arg1: i32) -> (i32, i32, i32) {
    %c0_i32 = arith.constant 0 : i32
    %c0_i32_0 = arith.constant 0 : i32
    return %arg0, %c0_i32, %arg1 : i32, i32, i32
  }
  func.func @transform_1(%arg0: i32, %arg1: i32) -> (i32, i32, i32) {
    %c0_i32 = arith.constant 0 : i32
    %c0_i32_0 = arith.constant 0 : i32
    %c0_i32_1 = arith.constant 0 : i32
    %c0_i32_2 = arith.constant 0 : i32
    return %c0_i32, %c0_i32_0, %c0_i32_1 : i32, i32, i32
  }
  func.func @transform_2(%arg0: i32, %arg1: i32) -> (i32, i32, i32) {
    %c0_i32 = arith.constant 0 : i32
    %c0_i32_0 = arith.constant 0 : i32
    %c0_i32_1 = arith.constant 0 : i32
    %c0_i32_2 = arith.constant 0 : i32
    return %c0_i32, %c0_i32_0, %c0_i32_1 : i32, i32, i32
  }
  func.func @transform_3(%arg0: i32, %arg1: i32) -> (i32, i32, i32) {
    %c0_i32 = arith.constant 0 : i32
    %c0_i32_0 = arith.constant 0 : i32
    return %arg0, %c0_i32, %arg1 : i32, i32, i32
  }
}

</mosaic_0001>

<bundles_post_ra>
// kernel: tpu_custom_call.1
= control target key start
LH: loop header
LB: loop body
LE: loop exit
PB: predicated region body
PF: predicated region fallthrough
CT: control target
= control target key end

     0   :  { %8 = vsyncpa [#allocation3], 0  ;;  %s875_s0 = inlined_call_operand.hbm [shape: f32[2,4,512], index: 0, kind: input, shape index: {}]   ;;  %s876_s1 = inlined_call_operand.vmem [shape: f32[1,4,1], index: 1, kind: input, shape index: {}]   ;;  %s877_s2 = inlined_call_operand.vmem [shape: f32[1,4,1], index: 2, kind: input, shape index: {}]   ;;  %s878_s3 = inlined_call_operand.hbm [shape: f32[2,4,512], index: 3, kind: output, shape index: {}]  }
   0x1   :  { %10 = vsyncpa [#allocation3 + $0x1], 0 }
   0x2   :  { %11 = vsyncpa [#allocation4], 0 }
   0x3   :  { %13 = vsyncpa [#allocation4 + $0x1], 0  ;;  %s675_s12 = smov 0   ;;  %s677_s13 = smov 0  }
   0x4   :  { %s679_s14 = smov 0   ;;  %s681_s15 = smov 0  }
   0x5   :  { %s683_s16 = smov 0   ;;  %s685_s17 = smov 0  }
   0x6 LB: > { %s445_s18 = sadd.s32 4294967295, %s649_s17   ;;  %s446_s19 = sadd.s32 4294967294, %s649_s17   ;;  %s649_s17 = sphi %s685_s17, %s19_s17   ;;  %s645_s16 = sphi %s683_s16, %s894_s16   ;;  %s641_s15 = sphi %s681_s15, %s893_s15   ;;  %s637_s14 = sphi %s679_s14, %s892_s14   ;;  %s633_s13 = sphi %s677_s13, %s891_s13   ;;  %s629_s12 = sphi %s675_s12, %s890_s12  }
   0x7   : > { %s31_s20 = sadd.s32 1, %s645_s16  ;;  %s40_s21 = sadd.s32 1, %s637_s14 }
   0x8   : > { %p33_p0 = scmp.ge.s32.totalorder %s31_s20, 2  ;;  %p47_p1 = scmp.ne.s32.totalorder %s637_s14, %s633_s13 }
   0x9   : > { %p48_p2 = scmp.eq.s32.totalorder %s649_s17, 0  ;;  %p53_p3 = scmp.ne.s32.totalorder %s633_s13, %s629_s12 }
   0xa   : > { %s896_s20 = smov (%p33_p0, %s31_s20), 0  ;;  %p54_p5 = scmp.eq.s32.totalorder %s445_s18, 0 }
   0xb   : > { %p716_p4 = por %p48_p2, %p47_p1  ;;  %s35_s23 = ssub.s32 %s645_s16, %s896_s20 }
   0xc   : > { %p121_p6 = scmp.eq.s32.totalorder %s445_s18, 1  ;;  %p38_p7 = scmp.eq.s32.totalorder %s35_s23, 0 }
   0xd   : > { %p722_p8 = por %p54_p5, %p53_p3  ;;  %p127_p10 = scmp.eq.s32.totalorder %s446_s19, 1 }
   0xe   : > { %p726_p9 = por %p121_p6, %p47_p1  ;;  %p474_p13 = scmp.lt.s32.totalorder %s649_s17, 2 }
   0xf   : > { %s731_s26 = scalar_select %p38_p7, %s637_s14, %s40_s21  }
  0x10   : > { %s882_s25 = scalar_select %p726_p9, 1, 0 }
  0x11   : > { %p733_p11 = por %p127_p10, %p53_p3  ;;  %s153_s28 = sand.u32 1, %s637_s14  }
  0x12   : > { %s449_s29 = sshll.u32 %s153_s28, 4  ;;  %s460_s30 = sshll.u32 %s645_s16, 8 }
  0x13   : > { %s883_s27 = scalar_select %p733_p11, 1, 0 }
  0x14   : > { %s744_s6 = scalar_lea.hbm %s875_s0, %s460_s30  ;;  %s157_s7 = scalar_lea.vmem [#allocation2], %s449_s29 }
  0x15   : > { %s167_s8 = sshll.u32 %s157_s7, 4  ;;  %p750_p0 = pnand %p474_p13, %p716_p4  ;;  %s746_s8 = int_to_ptr.vmem [resolvable:$true] %s167_s8 }
  0x16   : > { %s154_s10 = scalar_lea.sflag [#allocation3], %s153_s28  ;;  %s537_s11 = scalar_lea.hbm %s744_s6, 256 }
  0x17   : > { %p538_p3 = scmp.ne.s32.totalorder %s744_s6, %s537_s11  ;;  %p539_p5 = pneg %p750_p0 }
  0x18   : > { %s542_s21 = scalar_lea.hbm %s875_s0, 512  ;;  %p543_p4 = scmp.lt.u32.totalorder %s744_s6, %s875_s0 }
  0x19   : > { %p540_p6 = pnand %p539_p5, %p538_p3  ;;  %p544_p10 = scmp.lt.u32.totalorder %s542_s21, %s537_s11 }
  0x1a   : > { %p546_p12 = scmp.lt.u32.totalorder %s537_s11, %s744_s6 }
  0x1b   : > { %p541_p7 = pneg %p540_p6  ;;  %p545_p13 = por %p544_p10, %p543_p4 }
  0x1d   : > { %p547_p1 = por %p546_p12, %p545_p13 }
  0x1f   : > { %p548_p2 = pnand %p547_p1, %p541_p7 }
  0x21   : > { %551 = shalt.err (!%p548_p2)
}
  0x22   : > { %s552_s28 = scalar_lea.vmem %s746_s8, 256  ;;  %s651_s29 = smov [#allocation2]  }
  0x23   : > { %p553_p3 = scmp.ne.s32.totalorder %s746_s8, %s552_s28  ;;  %s557_s30 = sshll.u32 %s651_s29, 4  ;;  %s558_s30 = int_to_ptr.vmem [resolvable:$false] %s557_s30 }
  0x24   : > { %s559_s4 = scalar_lea.vmem %s558_s30, 512  ;;  %p560_p9 = scmp.lt.s32.totalorder %s746_s8, %s558_s30 }
  0x25   : > { %p555_p6 = pnand %p553_p3, %p539_p5  ;;  %p561_p4 = scmp.lt.s32.totalorder %s559_s4, %s552_s28 }
  0x27   : > { %p556_p11 = pneg %p555_p6  ;;  %p562_p10 = por %p561_p4, %p560_p9 }
  0x29   : > { %p563_p12 = pnand %p562_p10, %p556_p11 }
  0x2b   : > { %566 = shalt.err (!%p563_p12)
}
  0x2c   : > { %469 = dma.hbm_to_vmem [thread:$0]  (!%p750_p0), %s744_s6, 256, %s746_s8, %s154_s10  }
  0x2d   : > { %p885_p1 = scmp.lt.s32.totalorder %s649_s17, 3  ;;  %p886_p2 = scmp.ge.s32.totalorder %s649_s17, 1 }
  0x2f   : > { %p173_p5 = pnand %p886_p2, %p885_p1 }
  0x30   : > { %s786_s5 = sand.u32 (!%p173_p5), 1, %s633_s13  }
  0x31   : > { %176 = sbr.rel (%p173_p5) target bundleno = 209 (0xd1), region = 32  ;;  %s453_s7 = sshll.u32 (!%p173_p5), %s786_s5, 4 }
  0x32   : > { %s179_s11 = scalar_lea.sflag (!%p173_p5), [#allocation3], %s786_s5  ;;  %s182_s9 = scalar_lea.vmem (!%p173_p5), [#allocation2], %s453_s7 }
  0x38   : > { %620 = dma.done.wait (%p722_p8), %s179_s11, 256  }
  0x39   : > { %622 = vsyncadd (%p722_p8), %s179_s11, 4294967040  ;;  %v652_v0 = vmov 0   ;;  %v307_v1 = vld [vmem:[%s876_s1] sm:$0xf]  ;;  %v208_v4 = vld [vmem:[%s182_s9 + $0x8] sm:$0xff]  ;;  %vm215_vm0 = vcmask 1043456  }
  0x3a   : > { %526 = vset.pattern.permute.xlu0 %v652_v0  ;;  %v308_v2 = vld [vmem:[%s877_s2] sm:$0xf]  ;;  %v212_v6 = vcombine.high %v208_v4, %v208_v4  ;;  %v230_v9 = vsel %vm215_vm0, %v208_v4, 0.0  ;;  %s461_s24 = sshll.u32 %s641_s15, 8  ;;  %s204_s19 = scalar_lea.vmem [#allocation5], %s453_s7 }
  0x3b   : > { %311 = vperm.xlu0 %526, %v307_v1   ;;  %v207_v3 = vld [vmem:[%s182_s9] sm:$0xff]  ;;  %v231_v13 = vrot.slane %v230_v9, 4  ;;  %s361_s21 = sshll.u32 %s204_s19, 4  ;;  %s826_s28 = scalar_lea.hbm %s878_s3, %s461_s24  ;;  %s828_s21 = int_to_ptr.vmem [resolvable:$true] %s361_s21 }
  0x3c   : > { %v211_v5 = vcombine.high %v207_v3, %v207_v3  ;;  %v216_v7 = vsel %vm215_vm0, %v207_v3, 0.0  ;;  %v237_v10 = vsel %vm215_vm0, %v212_v6, 0.0  ;;  %s345_s15 = scalar_lea.sflag [#allocation4], %s786_s5  ;;  %s567_s29 = scalar_lea.vmem %s828_s21, 256 }
  0x3d   : > { %v217_v11 = vrot.slane %v216_v7, 4  ;;  %v238_v14 = vrot.slane %v237_v10, 4  ;;  %v232_v17 = vadd.f32 %v231_v13, %v230_v9  ;;  %p568_p8 = scmp.ne.s32.totalorder %s828_s21, %s567_s29  ;;  %p887_p9 = scmp.ne.s32.totalorder %s882_s25, 0 }
  0x3e   : > { %v223_v8 = vsel %vm215_vm0, %v211_v5, 0.0  ;;  %s654_s30 = smov [#allocation5]  }
  0x3f   : > { %330 = vperm.xlu0 %526, %v308_v2   ;;  %v224_v12 = vrot.slane %v223_v8, 4  ;;  %v218_v15 = vadd.f32 %v217_v11, %v216_v7  ;;  %v239_v18 = vadd.f32 %v238_v14, %v237_v10  ;;  %v233_v21 = vrot.slane %v232_v17, 2  ;;  %p569_p11 = pnand %p568_p8, %p887_p9  ;;  %s571_s4 = sshll.u32 %s654_s30, 4  ;;  %s572_s4 = int_to_ptr.vmem [resolvable:$false] %s571_s4 }
  0x40   : > { %s573_s7 = scalar_lea.vmem %s572_s4, 512  ;;  %p574_p7 = scmp.lt.s32.totalorder %s828_s21, %s572_s4 }
  0x41   : > { %v225_v16 = vadd.f32 %v224_v12, %v223_v8  ;;  %v219_v19 = vrot.slane %v218_v15, 2  ;;  %v240_v22 = vrot.slane %v239_v18, 2  ;;  %v234_v25 = vadd.f32 %v233_v21, %v232_v17  ;;  %p570_p0 = pneg %p569_p11  ;;  %p575_p13 = scmp.lt.s32.totalorder %s573_s7, %s567_s29 }
  0x42   : > { %v335_v21 = vlaneseq }
  0x43   : > { %v226_v20 = vrot.slane %v225_v16, 2  ;;  %v220_v23 = vadd.f32 %v219_v19, %v218_v15  ;;  %v241_v26 = vadd.f32 %v240_v22, %v239_v18  ;;  %v235_v29 = vrot.slane %v234_v25, 1  ;;  %p576_p3 = por %p575_p13, %p574_p7 }
  0x44   : > { %v653_v19 = vmov 839922192  }
  0x45   : > { %v227_v24 = vadd.f32 %v226_v20, %v225_v16  ;;  %v221_v27 = vrot.slane %v220_v23, 1  ;;  %v242_v30 = vrot.slane %v241_v26, 1  ;;  %v236_v33 = vadd.f32 %v235_v29, %v234_v25  ;;  %p577_p6 = pnand %p576_p3, %p570_p0 }
  0x46   : > { %v333_v20 = vunpack.c.l.s4 %v653_v19  ;;  %v336_v25 = vshrl.u32 %v335_v21, 7 }
  0x47   : > { %v228_v28 = vrot.slane %v227_v24, 1  ;;  %v222_v31 = vadd.f32 %v221_v27, %v220_v23  ;;  %v243_v34 = vadd.f32 %v242_v30, %v241_v26  ;;  %v247_v37 = vmul.f32 0.25, %v236_v33 }
  0x49   : > { %v229_v32 = vadd.f32 %v228_v28, %v227_v24  ;;  %v245_v35 = vmul.f32 0.25, %v222_v31  ;;  %v248_v38 = vmul.f32 0.25, %v243_v34  ;;  %v334_v24 = vunpack.c.0.s8 %v333_v20 }
  0x4b   : > { %v246_v36 = vmul.f32 0.25, %v229_v32  ;;  %v254_v40 = vcombine.low %v247_v37, %v248_v38  ;;  %v337_v29 = vsub.s32 %v334_v24, %v336_v25 }
  0x4d   : > { %v253_v39 = vcombine.low %v245_v35, %v246_v36  ;;  %v808_v42 = vsub.f32 %v208_v4, %v254_v40 }
  0x4f   : > { %v806_v41 = vsub.f32 %v207_v3, %v253_v39  ;;  %v260_v44 = vmul.f32 %v808_v42, %v808_v42 }
  0x51   : > { %v259_v43 = vmul.f32 %v806_v41, %v806_v41  ;;  %v264_v46 = vcombine.high %v260_v44, %v260_v44  ;;  %v281_v48 = vsel %vm215_vm0, %v260_v44, 0.0 }
  0x52   : > { %v282_v52 = vrot.slane %v281_v48, 4 }
  0x53   : > { %v263_v45 = vcombine.high %v259_v43, %v259_v43  ;;  %v267_v47 = vsel %vm215_vm0, %v259_v43, 0.0  ;;  %v288_v51 = vsel %vm215_vm0, %v264_v46, 0.0 }
  0x54   : > { %v268_v50 = vrot.slane %v267_v47, 4  ;;  %v289_v54 = vrot.slane %v288_v51, 4  ;;  %v283_v56 = vadd.f32 %v282_v52, %v281_v48 }
  0x55   : > { %v274_v49 = vsel %vm215_vm0, %v263_v45, 0.0 }
  0x56   : > { %v275_v53 = vrot.slane %v274_v49, 4  ;;  %v269_v55 = vadd.f32 %v268_v50, %v267_v47  ;;  %v290_v58 = vadd.f32 %v289_v54, %v288_v51  ;;  %v284_v60 = vrot.slane %v283_v56, 2 }
  0x58   : > { %v276_v57 = vadd.f32 %v275_v53, %v274_v49  ;;  %v270_v59 = vrot.slane %v269_v55, 2  ;;  %v291_v62 = vrot.slane %v290_v58, 2  ;;  %v285_v0 = vadd.f32 %v284_v60, %v283_v56 }
  0x5a   : > { %v277_v61 = vrot.slane %v276_v57, 2  ;;  %v271_v63 = vadd.f32 %v270_v59, %v269_v55  ;;  %v292_v2 = vadd.f32 %v291_v62, %v290_v58  ;;  %v286_v4 = vrot.slane %v285_v0, 1 }
  0x5c   : > { %v278_v1 = vadd.f32 %v277_v61, %v276_v57  ;;  %v272_v3 = vrot.slane %v271_v63, 1  ;;  %v293_v6 = vrot.slane %v292_v2, 1  ;;  %v287_v8 = vadd.f32 %v286_v4, %v285_v0 }
  0x5e   : > { %v279_v5 = vrot.slane %v278_v1, 1  ;;  %v273_v7 = vadd.f32 %v272_v3, %v271_v63  ;;  %v294_v10 = vadd.f32 %v293_v6, %v292_v2  ;;  %v297_v12 = vmul.f32 0.25, %v287_v8 }
  0x60   : > { %v280_v9 = vadd.f32 %v279_v5, %v278_v1  ;;  %v295_v11 = vmul.f32 0.25, %v273_v7  ;;  %v298_v14 = vmul.f32 0.25, %v294_v10  ;;  %v301_v16 = vadd.f32 1e-06, %v297_v12 }
  0x62   : > { %v296_v13 = vmul.f32 0.25, %v280_v9  ;;  %v299_v15 = vadd.f32 1e-06, %v295_v11  ;;  %v302_v18 = vadd.f32 1e-06, %v298_v14 }
  0x64   : > { %v300_v17 = vadd.f32 1e-06, %v296_v13  ;;  %529 = vrsqrt.f32 %v299_v15 }
  0x65   : > { %531 = vrsqrt.f32 %v301_v16 }
  0x66   : > { %533 = vrsqrt.f32 %v300_v17 }
  0x67   : > { %535 = vrsqrt.f32 %v302_v18 }
  0x6e   : > { %v530_v22 = vpop.eup %529 }
  0x6f   : > { %v532_v23 = vpop.eup %531 }
  0x70   : > { %v534_v26 = vpop.eup %533 }
  0x71   : > { %v536_v27 = vpop.eup %535 }
  0xba   : > { %v312_v28 = vpop.permute.xlu0 %311 }
  0xbb   : > { %v314_v30 = vmul.f32 %v530_v22, %v312_v28  ;;  %v315_v31 = vmul.f32 %v534_v26, %v312_v28  ;;  %v316_v32 = vmul.f32 %v532_v23, %v312_v28  ;;  %v317_v33 = vmul.f32 %v536_v27, %v312_v28 }
  0xbd   : > { %v322_v34 = vcombine.low %v314_v30, %v315_v31  ;;  %v323_v35 = vcombine.low %v316_v32, %v317_v33 }
  0xbe   : > { %v331_v36 = vpop.permute.xlu0 %330 }
  0xbf   : > { %v326_v37 = vmul.f32 %v322_v34, %v806_v41  ;;  %v327_v38 = vmul.f32 %v323_v35, %v808_v42  ;;  %v338_v39 = vrot.slane %v331_v36, %v337_v29 }
  0xc1   : > { %v340_v40 = vadd.f32 %v338_v39, %v326_v37  ;;  %v341_v43 = vadd.f32 %v338_v39, %v327_v38 }
  0xc3   : > { %342 = vst [vmem:[%s204_s19] sm:$0xff] %v340_v40  ;;  %343 = vst [vmem:[%s204_s19 + $0x8] sm:$0xff] %v341_v43 }
  0xc4   : > { %580 = shalt.err (!%p577_p6)
}
  0xc5   : > { %s581_s5 = scalar_lea.hbm %s826_s28, 256  ;;  %s585_s6 = scalar_lea.hbm %s878_s3, 512 }
  0xc6   : > { %p582_p4 = scmp.ne.s32.totalorder %s826_s28, %s581_s5  ;;  %p586_p1 = scmp.lt.u32.totalorder %s826_s28, %s878_s3 }
  0xc7   : > { %p587_p2 = scmp.lt.u32.totalorder %s585_s6, %s581_s5  ;;  %p589_p8 = scmp.lt.u32.totalorder %s581_s5, %s826_s28 }
  0xc8   : > { %p583_p10 = pnand %p582_p4, %p887_p9 }
  0xc9   : > { %p588_p5 = por %p587_p2, %p586_p1 }
  0xca   : > { %p584_p12 = pneg %p583_p10 }
  0xcb   : > { %p590_p11 = por %p589_p8, %p588_p5 }
  0xcd   : > { %p591_p0 = pnand %p590_p11, %p584_p12 }
  0xcf   : > { %594 = shalt.err (!%p591_p0)
}
  0xd0   : > { %464 = dma.vmem_to_hbm [thread:$0]  (%p887_p9), %s828_s21, 256, %s826_s28, %s345_s15  }
  0xd1 PF: > { %s373_s18 = sand.u32 1, %s629_s12   ;;  %p888_p7 = scmp.ne.s32.totalorder %s883_s27, 0 }
  0xd2   : > { %p889_p13 = scmp.ge.s32.totalorder %s649_s17, 2  ;;  %s374_s24 = scalar_lea.sflag [#allocation4], %s373_s18 }
  0xd4   : > { %p471_p3 = pnand %p889_p13, %p888_p7 }
  0xd6   : > { %624 = dma.done.wait (!%p471_p3), %s374_s24, 256  }
  0xd7   : > { %626 = vsyncadd (!%p471_p3), %s374_s24, 4294967040  ;;  %s19_s17 = sadd.s32 1, %s649_s17   ;;  %s890_s12 = smov %s633_s13 }
  0xd8   : > { %p16_p6 = scmp.ge.s32.totalorder %s19_s17, 4   ;;  %s891_s13 = smov %s637_s14 }
  0xd9   : > { %s892_s14 = smov %s731_s26  ;;  %s893_s15 = smov %s645_s16 }
  0xda   : > { %s894_s16 = smov %s896_s20  ;;  %18 = sbr.rel (!%p16_p6) target bundleno = 6 (0x6), region = 77 }
  0xe1   :  { %379 = vsyncpa [#allocation3], 1 }
  0xe2   :  { %381 = vsyncpa [#allocation3 + $0x1], 1 }
  0xe3   :  { %382 = vsyncpa [#allocation4], 1 }
  0xe4   :  { %384 = vsyncpa [#allocation4 + $0x1], 1 }

</bundles_post_ra>
